<compile_context>
chip_gen: v7x
topology: tpu7x:2x2x1
jax: 0.10.0
libtpu: 0.0.40
codegen_flags: <defaults>
</compile_context>

<pallas_src>
import functools

import jax
import jax.numpy as jnp
from jax.experimental import pallas as pl
from jax.experimental.pallas import tpu as pltpu

_EPS = 1e-6
_LANES = 128
_TBC_CAP = 64          # sanity cap only; VMEM budget is the real limiter


# --------------------------------------------------------------------------
# Kernel
# --------------------------------------------------------------------------
def _silog_kernel(*refs, masked, interpolate):
    """One grid step processes one lane-dense (H, tbc*W) slab of B*C slices."""
    i = 0
    if interpolate:
        wh_ref, wbd_ref = refs[i], refs[i + 1]
        i += 2
    x_ref, t_ref = refs[i], refs[i + 1]
    i += 2
    m_ref = None
    if masked:
        m_ref = refs[i]
        i += 1
    out_ref = refs[i]
    acc_s, acc_q = refs[i + 1], refs[i + 2]
    acc_n = refs[i + 3] if masked else None

    s_idx = pl.program_id(1)

    @pl.when(s_idx == 0)
    def _init():
        acc_s[...] = jnp.zeros_like(acc_s)
        acc_q[...] = jnp.zeros_like(acc_q)
        if masked:
            acc_n[...] = jnp.zeros_like(acc_n)

    x = x_ref[0].astype(jnp.float32)            # (Hi, tbc*Wi) or (Ho, tbc*Wo)
    if interpolate:
        # W-resize of all tbc slices with ONE matmul against the block-diagonal
        # interpolation matrix (f32 accumulation, intermediate stays f32).
        a = jnp.dot(x, wbd_ref[...], preferred_element_type=jnp.float32)   # (Hi, tbc*Wo)
        # H-resize of all tbc slices with ONE lane-dense matmul.
        xi = jnp.dot(wh_ref[...], a, preferred_element_type=jnp.float32)   # (Ho, tbc*Wo)
    else:
        xi = x

    t = t_ref[0].astype(jnp.float32)            # (Ho, tbc*Wo)
    log_err = jnp.log((xi + _EPS) / (t + _EPS))  # one EUP transcendental / element

    if masked:
        # TODO(synk): PyTorch's ragged `input[mask]` gather is realized as a
        # 0/1 where-mask + masked count (numerically equivalent reduction).
        valid = m_ref[0] != 0
        err = jnp.where(valid, log_err, 0.0)     # no NaN poisoning
        acc_n[...] += valid.astype(jnp.float32)
    else:
        err = log_err

    # Each accumulator ref is updated exactly once per grid step.
    acc_s[...] += err
    acc_q[...] += err * err

    @pl.when(s_idx == pl.num_programs(1) - 1)
    def _finalize():
        lane = jax.lax.broadcasted_iota(jnp.int32, (1, 1, _LANES), 2)
        row = jnp.where(lane == 0, jnp.sum(acc_s[...]), 0.0)
        row = row + jnp.where(lane == 1, jnp.sum(acc_q[...]), 0.0)
        if masked:
            row = row + jnp.where(lane == 2, jnp.sum(acc_n[...]), 0.0)
        out_ref[...] = row


# --------------------------------------------------------------------------
# Wrapper-side helpers
# --------------------------------------------------------------------------
def _interp_matrix(out_size: int, in_size: int) -> jnp.ndarray:
    """1-D linear interpolation matrix, align_corners=True semantics (f32)."""
    if in_size == 1:
        return jnp.ones((out_size, 1), dtype=jnp.float32)
    if out_size == 1:
        src = jnp.zeros((1,), dtype=jnp.float32)
    else:
        scale = (in_size - 1) / (out_size - 1)
        src = jnp.arange(out_size, dtype=jnp.float32) * scale
    lo = jnp.clip(jnp.floor(src).astype(jnp.int32), 0, in_size - 2)
    frac = src - lo.astype(jnp.float32)
    w_lo = jax.nn.one_hot(lo, in_size, dtype=jnp.float32) * (1.0 - frac)[:, None]
    w_hi = jax.nn.one_hot(lo + 1, in_size, dtype=jnp.float32) * frac[:, None]
    return w_lo + w_hi


def _block_diag(w: jnp.ndarray, n: int) -> jnp.ndarray:
    """(R, C) -> (n*R, n*C) block-diagonal replication of w."""
    r, c = w.shape
    eye = jnp.eye(n, dtype=w.dtype)
    return (eye[:, None, :, None] * w[None, :, None, :]).reshape(n * r, n * c)


def _to_slabs(x3, steps, tbc, pad_val):
    """(bc, H, W) -> (steps, H, tbc*W); pads the slice axis with `pad_val`."""
    bc, h, w = x3.shape
    pad = steps * tbc - bc
    if pad:
        x3 = jnp.concatenate(
            [x3, jnp.full((pad, h, w), pad_val, dtype=x3.dtype)], axis=0)
    return (x3.reshape(steps, tbc, h, w)
              .transpose(0, 2, 1, 3)
              .reshape(steps, h, tbc * w))


def _round_up(x, m):
    return (x + m - 1) // m * m


def _tile_bytes(rows, cols, itemsize):
    """VMEM footprint of a 2-D buffer including (sublane, lane) tile padding."""
    sub = {4: 8, 2: 16, 1: 32}.get(itemsize, 8)
    return _round_up(max(rows, 1), sub) * _round_up(max(cols, 1), _LANES) * itemsize


def _vmem_physical_bytes():
    try:
        return int(pltpu.get_tpu_info().vmem_capacity_bytes)
    except Exception:
        return 64 * 1024 * 1024          # v7x-safe fallback


def _max_tbc(hi, wi, ho, wo, in_bytes, tgt_bytes, masked, interpolate, budget):
    """Largest tbc whose (padded, double-buffered) working set fits the budget."""
    def est(tbc):
        sw = tbc * wo
        b = 0
        if interpolate:
            b += 2 * _tile_bytes(hi, tbc * wi, in_bytes)      # input slab x2 bufs
            b += 2 * _tile_bytes(ho, hi, 4)                   # wh x2 bufs
            b += 2 * _tile_bytes(tbc * wi, sw, 4)             # block-diag W x2 bufs
            b += _tile_bytes(hi, sw, 4)                       # intermediate a
        else:
            b += 2 * _tile_bytes(ho, sw, in_bytes)            # input slab x2 bufs
        b += 2 * _tile_bytes(ho, sw, tgt_bytes)               # target slab x2 bufs
        if masked:
            b += 2 * _tile_bytes(ho, sw, 1)                   # int8 mask slab x2 bufs
        n_acc = 3 if masked else 2
        b += n_acc * _tile_bytes(ho, sw, 4)                   # accumulators
        b += 4 * _tile_bytes(ho, sw, 4)                       # live f32 temporaries
        return b

    best = 1
    for t in range(1, _TBC_CAP + 1):
        if est(t) <= budget:
            best = t
        else:
            break
    return best


# --------------------------------------------------------------------------
# Public entry point
# --------------------------------------------------------------------------
@functools.partial(jax.jit, static_argnames=("interpolate",))
def silog_loss(inp, target, mask=None, interpolate=True):
    """SILog loss.  inp: (B, C, Hi, Wi), target: (B, C, Ho, Wo), NCHW.

    Notes:
      * SILog.weight is stored but unused by the PyTorch forward, so it is
        omitted here as well.
      * Degenerate empty-mask case returns sqrt(eps) instead of PyTorch's NaN
        (intentional, documented divergence)."""
    B, C, Hi, Wi = inp.shape
    _, _, Ho, Wo = target.shape
    bc = B * C
    masked = mask is not None
    if not interpolate:
        assert (Hi, Wi) == (Ho, Wo), "interpolate=False requires equal sizes"

    vmem_limit = min(int(_vmem_physical_bytes() * 3 // 4), 100 * 1024 * 1024)
    budget = int(vmem_limit * 0.85)
    max_tbc = _max_tbc(Hi, Wi, Ho, Wo, inp.dtype.itemsize, target.dtype.itemsize,
                       masked, interpolate, budget)

    tbc_dense = max(1, pl.cdiv(_LANES, Wo))        # slab width >= 128 lanes
    tbc_pref = max(1, pl.cdiv(2 * _LANES, Wo))     # slab width >= 256 lanes
    tbc = min(max_tbc, tbc_pref if bc * Wo >= 2 * _LANES else tbc_dense)
    tbc = max(1, min(tbc, max(bc, tbc_dense)))     # don't over-pad tiny batches

    steps = pl.cdiv(bc, tbc)
    # Prefer an even step count so the "parallel" axis splits across both
    # TensorCores of a v7x chip (harmless on single-core chips).
    if steps == 1 and bc > tbc_dense and tbc >= 2 * tbc_dense:
        steps = 2
    elif steps > 1 and steps % 2 == 1:
        steps += 1
    tbc = max(pl.cdiv(bc, steps), min(tbc_dense, max_tbc))
    tbc = min(tbc, max_tbc)
    P = 2 if steps % 2 == 0 else 1
    S = steps // P
    slab_w = tbc * Wo

    # ---- wrapper-side layout plumbing: lane-dense slabs (original dtypes) ----
    src_hw = (Hi, Wi) if interpolate else (Ho, Wo)
    x_sl = _to_slabs(inp.reshape(bc, *src_hw), steps, tbc, 1.0)
    t_sl = _to_slabs(target.reshape(bc, Ho, Wo), steps, tbc, 1.0)

    operands, in_specs = [], []
    if interpolate:
        wh = _interp_matrix(Ho, Hi)                              # (Ho, Hi) f32
        wbd = _block_diag(_interp_matrix(Wo, Wi).T, tbc)         # (tbc*Wi, tbc*Wo) f32
        operands += [wh, wbd]
        in_specs += [pl.BlockSpec((Ho, Hi), lambda p, s: (0, 0)),
                     pl.BlockSpec((tbc * Wi, tbc * Wo), lambda p, s: (0, 0))]
    operands += [x_sl, t_sl]
    in_specs += [
        pl.BlockSpec((1, src_hw[0], tbc * src_hw[1]), lambda p, s: (p * S + s, 0, 0)),
        pl.BlockSpec((1, Ho, slab_w), lambda p, s: (p * S + s, 0, 0)),
    ]
    scratch = [pltpu.VMEM((Ho, slab_w), jnp.float32),
               pltpu.VMEM((Ho, slab_w), jnp.float32)]
    if masked:
        m_sl = _to_slabs(mask.reshape(bc, Ho, Wo).astype(jnp.int8), steps, tbc, 0)
        operands.append(m_sl)
        in_specs.append(pl.BlockSpec((1, Ho, slab_w), lambda p, s: (p * S + s, 0, 0)))
        scratch.append(pltpu.VMEM((Ho, slab_w), jnp.float32))

    parts = pl.pallas_call(
        functools.partial(_silog_kernel, masked=masked, interpolate=interpolate),
        out_shape=jax.ShapeDtypeStruct((P, 1, _LANES), jnp.float32),
        grid_spec=pltpu.PrefetchScalarGridSpec(
            num_scalar_prefetch=0,
            grid=(P, S),
            in_specs=in_specs,
            out_specs=pl.BlockSpec((1, 1, _LANES), lambda p, s: (p, 0, 0)),
            scratch_shapes=scratch,
        ),
        compiler_params=pltpu.CompilerParams(
            dimension_semantics=("parallel", "arbitrary"),
            vmem_limit_bytes=vmem_limit),
    )(*operands)

    # Scalar epilogue (combine per-core partials) in the wrapper.
    s_tot = jnp.sum(parts[:, 0, 0])
    q_tot = jnp.sum(parts[:, 0, 1])
    if masked:
        n = jnp.sum(parts[:, 0, 2])
    else:
        n = jnp.asarray(bc * Ho * Wo, jnp.float32)   # compile-time constant
    n_safe = jnp.maximum(n, 1.0)
    mean = s_tot / n_safe
    # torch.var default is unbiased (divide by N-1); guard degenerate counts.
    var = (q_tot - s_tot * mean) / jnp.maximum(n - 1.0, 1.0)
    dg = var + 0.15 * mean * mean
    return jnp.sqrt(dg + _EPS)


# --------------------------------------------------------------------------
# Pure-JAX reference (f32 interpolation, torch-literal formulas)
# --------------------------------------------------------------------------
def _silog_ref(inp, target, mask=None, interpolate=True):
    B, C, Hi, Wi = inp.shape
    _, _, Ho, Wo = target.shape
    bc = B * C
    x = inp.reshape(bc, Hi, Wi).astype(jnp.float32)
    if interpolate:
        wh = _interp_matrix(Ho, Hi)              # (Ho, Hi)
        ww = _interp_matrix(Wo, Wi)              # (Wo, Wi)
        xi = jnp.einsum("oh,bhw,pw->bop", wh, x, ww)
    else:
        xi = x
    t = target.reshape(bc, Ho, Wo).astype(jnp.float32)
    log_err = jnp.log(xi + _EPS) - jnp.log(t + _EPS)
    if mask is not None:
        m = mask.reshape(bc, Ho, Wo) != 0
        le = jnp.where(m, log_err, 0.0)
        n = jnp.sum(m.astype(jnp.float32))
        s = jnp.sum(le)
        q = jnp.sum(le * le)
        mean = s / n
        var = (q - s * mean) / (n - 1.0)
    else:
        mean = jnp.mean(log_err)
        var = jnp.var(log_err, ddof=1)           # torch.var default: unbiased
    dg = var + 0.15 * mean * mean
    return jnp.sqrt(dg + _EPS)


if __name__ == "__main__":
    key = jax.random.PRNGKey(0)
    k1, k2, k3, k4, k5, k6, k7 = jax.random.split(key, 7)

    # ---- test 1: bf16 sources, no mask, bilinear upsample 16x16 -> 32x32 ----
    inp = jax.random.uniform(k1, (2, 4, 16, 16), jnp.float32, 0.1, 2.0).astype(jnp.bfloat16)
    tgt = jax.random.uniform(k2, (2, 4, 32, 32), jnp.float32, 0.1, 2.0).astype(jnp.bfloat16)
    out = silog_loss(inp, tgt, mask=None, interpolate=True)
    jax.block_until_ready(out)
    ref = _silog_ref(inp, tgt, None, True)
    assert jnp.allclose(out, ref, rtol=2e-3, atol=1e-4), (out, ref)

    # ---- test 2: f32 sources + boolean mask, upsample 8x8 -> 16x16 (P=2) ----
    inp2 = jax.random.uniform(k3, (8, 4, 8, 8), jnp.float32, 0.1, 2.0)
    tgt2 = jax.random.uniform(k4, (8, 4, 16, 16), jnp.float32, 0.1, 2.0)
    msk2 = jax.random.uniform(k5, (8, 4, 16, 16)) > 0.3
    out2 = silog_loss(inp2, tgt2, mask=msk2, interpolate=True)
    jax.block_until_ready(out2)
    ref2 = _silog_ref(inp2, tgt2, msk2, True)
    assert jnp.allclose(out2, ref2, rtol=2e-3, atol=1e-4), (out2, ref2)

    # ---- test 3: interpolate=False, mask, non-divisor B*C (slice padding) ----
    inp3 = jax.random.uniform(k6, (1, 3, 16, 16), jnp.float32, 0.1, 2.0)
    tgt3 = jax.random.uniform(k7, (1, 3, 16, 16), jnp.float32, 0.1, 2.0)
    msk3 = jax.random.uniform(k5, (1, 3, 16, 16)) > 0.4
    out3 = silog_loss(inp3, tgt3, mask=msk3, interpolate=False)
    jax.block_until_ready(out3)
    ref3 = _silog_ref(inp3, tgt3, msk3, False)
    assert jnp.allclose(out3, ref3, rtol=2e-3, atol=1e-4), (out3, ref3)

    # ---- test 4: unmasked, interp, non-divisor B*C (padding, static count) ----
    inp4 = jax.random.uniform(k1, (2, 3, 8, 8), jnp.float32, 0.1, 2.0)
    tgt4 = jax.random.uniform(k2, (2, 3, 16, 16), jnp.float32, 0.1, 2.0)
    out4 = silog_loss(inp4, tgt4, mask=None, interpolate=True)
    jax.block_until_ready(out4)
    ref4 = _silog_ref(inp4, tgt4, None, True)
    assert jnp.allclose(out4, ref4, rtol=2e-3, atol=1e-4), (out4, ref4)

    print("KERNEL_OK")
</pallas_src>

<mosaic_0001>
module attributes {stable_mosaic.version = 11 : i64} {
  func.func @_silog_kernel(%arg0: i32, %arg1: i32, %arg2: memref<32x16xf32, #tpu.memory_space<vmem>>, %arg3: memref<64x128xf32, #tpu.memory_space<vmem>>, %arg4: memref<1x16x64xbf16, #tpu.memory_space<vmem>>, %arg5: memref<1x32x128xbf16, #tpu.memory_space<vmem>>, %arg6: memref<1x1x128xf32, #tpu.memory_space<vmem>>, %arg7: memref<32x128xf32, #tpu.memory_space<vmem>>, %arg8: memref<32x128xf32, #tpu.memory_space<vmem>>) attributes {dimension_semantics = [#tpu.dimension_semantics<parallel>, #tpu.dimension_semantics<arbitrary>], iteration_bounds = array<i64: 2, 1>, scalar_prefetch = 0 : i64, scratch_operands = 2 : i64, tpu.core_type = #tpu.core_type<tc>, window_params = [{pipeline_mode = #tpu.pipeline_mode<synchronous>, transform_indices = @transform_0, window_bounds = array<i64: 32, 16>}, {pipeline_mode = #tpu.pipeline_mode<synchronous>, transform_indices = @transform_1, window_bounds = array<i64: 64, 128>}, {transform_indices = @transform_2, window_bounds = array<i64: 1, 16, 64>}, {transform_indices = @transform_3, window_bounds = array<i64: 1, 32, 128>}, {transform_indices = @transform_4, window_bounds = array<i64: 1, 1, 128>}]} {
    %c0_i32 = arith.constant 0 : i32
    %0 = arith.cmpi eq, %arg1, %c0_i32 : i32
    %1 = arith.extui %0 : i1 to i32
    %c0_i32_0 = arith.constant 0 : i32
    %2 = arith.cmpi ne, %1, %c0_i32_0 : i32
    scf.if %2 {
      %cst_23 = arith.constant 0.000000e+00 : f32
      %29 = vector.broadcast %cst_23 : f32 to vector<32x128xf32>
      %c0_24 = arith.constant 0 : index
      %c0_25 = arith.constant 0 : index
      %30 = vector.load %arg7[%c0_24, %c0_25] : memref<32x128xf32, #tpu.memory_space<vmem>>, vector<32x128xf32>
      tpu.vector_store %arg7[%c0_24, %c0_25], %29 {strides = array<i32>} : memref<32x128xf32, #tpu.memory_space<vmem>>, vector<32x128xf32>,
      %cst_26 = arith.constant 0.000000e+00 : f32
      %31 = vector.broadcast %cst_26 : f32 to vector<32x128xf32>
      %c0_27 = arith.constant 0 : index
      %c0_28 = arith.constant 0 : index
      %32 = vector.load %arg8[%c0_27, %c0_28] : memref<32x128xf32, #tpu.memory_space<vmem>>, vector<32x128xf32>
      tpu.vector_store %arg8[%c0_27, %c0_28], %31 {strides = array<i32>} : memref<32x128xf32, #tpu.memory_space<vmem>>, vector<32x128xf32>,
    } else {
    }
    %c0 = arith.constant 0 : index
    %c0_1 = arith.constant 0 : index
    %c0_2 = arith.constant 0 : index
    %3 = vector.load %arg4[%c0, %c0_1, %c0_2] : memref<1x16x64xbf16, #tpu.memory_space<vmem>>, vector<1x16x64xbf16>
    %4 = vector.shape_cast %3 : vector<1x16x64xbf16> to vector<16x64xbf16>
    %5 = arith.extf %4 : vector<16x64xbf16> to vector<16x64xf32>
    %c0_3 = arith.constant 0 : index
    %c0_4 = arith.constant 0 : index
    %6 = vector.load %arg3[%c0_3, %c0_4] : memref<64x128xf32, #tpu.memory_space<vmem>>, vector<64x128xf32>
    %cst = arith.constant dense<0.000000e+00> : vector<16x128xf32>
    %7 = tpu.matmul %5, %6, %cst {dimension_numbers = #tpu.dot_dimension_numbers<[1], [0], [0], [1], [0, 0, 1, 1], [], []>} : vector<16x64xf32>, vector<64x128xf32>, vector<16x128xf32> -> vector<16x128xf32>
    %c0_5 = arith.constant 0 : index
    %c0_6 = arith.constant 0 : index
    %8 = vector.load %arg2[%c0_5, %c0_6] : memref<32x16xf32, #tpu.memory_space<vmem>>, vector<32x16xf32>
    %cst_7 = arith.constant dense<0.000000e+00> : vector<32x128xf32>
    %9 = tpu.matmul %8, %7, %cst_7 {dimension_numbers = #tpu.dot_dimension_numbers<[1], [0], [0], [1], [0, 0, 1, 1], [], []>} : vector<32x16xf32>, vector<16x128xf32>, vector<32x128xf32> -> vector<32x128xf32>
    %c0_8 = arith.constant 0 : index
    %c0_9 = arith.constant 0 : index
    %c0_10 = arith.constant 0 : index
    %10 = vector.load %arg5[%c0_8, %c0_9, %c0_10] : memref<1x32x128xbf16, #tpu.memory_space<vmem>>, vector<1x32x128xbf16>
    %11 = vector.shape_cast %10 : vector<1x32x128xbf16> to vector<32x128xbf16>
    %12 = arith.extf %11 : vector<32x128xbf16> to vector<32x128xf32>
    %cst_11 = arith.constant 9.99999997E-7 : f32
    %13 = vector.broadcast %cst_11 : f32 to vector<32x128xf32>
    %14 = arith.addf %9, %13 : vector<32x128xf32>
    %cst_12 = arith.constant 9.99999997E-7 : f32
    %15 = vector.broadcast %cst_12 : f32 to vector<32x128xf32>
    %16 = arith.addf %12, %15 : vector<32x128xf32>
    %17 = arith.divf %14, %16 : vector<32x128xf32>
    %18 = math.log %17 : vector<32x128xf32>
    %c0_13 = arith.constant 0 : index
    %c0_14 = arith.constant 0 : index
    %19 = vector.load %arg7[%c0_13, %c0_14] : memref<32x128xf32, #tpu.memory_space<vmem>>, vector<32x128xf32>
    %20 = arith.addf %19, %18 : vector<32x128xf32>
    %c0_15 = arith.constant 0 : index
    %c0_16 = arith.constant 0 : index
    %21 = vector.load %arg7[%c0_15, %c0_16] : memref<32x128xf32, #tpu.memory_space<vmem>>, vector<32x128xf32>
    tpu.vector_store %arg7[%c0_15, %c0_16], %20 {strides = array<i32>} : memref<32x128xf32, #tpu.memory_space<vmem>>, vector<32x128xf32>,
    %c0_17 = arith.constant 0 : index
    %c0_18 = arith.constant 0 : index
    %22 = vector.load %arg8[%c0_17, %c0_18] : memref<32x128xf32, #tpu.memory_space<vmem>>, vector<32x128xf32>
    %23 = arith.mulf %18, %18 : vector<32x128xf32>
    %24 = arith.addf %22, %23 : vector<32x128xf32>
    %c0_19 = arith.constant 0 : index
    %c0_20 = arith.constant 0 : index
    %25 = vector.load %arg8[%c0_19, %c0_20] : memref<32x128xf32, #tpu.memory_space<vmem>>, vector<32x128xf32>
    tpu.vector_store %arg8[%c0_19, %c0_20], %24 {strides = array<i32>} : memref<32x128xf32, #tpu.memory_space<vmem>>, vector<32x128xf32>,
    %c0_i32_21 = arith.constant 0 : i32
    %26 = arith.cmpi eq, %arg1, %c0_i32_21 : i32
    %27 = arith.extui %26 : i1 to i32
    %c0_i32_22 = arith.constant 0 : i32
    %28 = arith.cmpi ne, %27, %c0_i32_22 : i32
    scf.if %28 {
      %29 = tpu.iota {dimensions = array<i32: 2>} : vector<1x1x128xi32>
      %c0_i32_23 = arith.constant 0 : i32
      %30 = vector.broadcast %c0_i32_23 : i32 to vector<1x1x128xi32>
      %31 = arith.cmpi eq, %29, %30 : vector<1x1x128xi32>
      %c0_24 = arith.constant 0 : index
      %c0_25 = arith.constant 0 : index
      %32 = vector.load %arg7[%c0_24, %c0_25] : memref<32x128xf32, #tpu.memory_space<vmem>>, vector<32x128xf32>
      %33 = vector.shape_cast %32 : vector<32x128xf32> to vector<1x32x128xf32>
      %cst_26 = arith.constant dense<0.000000e+00> : vector<1xf32>
      %34 = vector.multi_reduction <add>, %33, %cst_26 [1, 2] : vector<1x32x128xf32> to vector<1xf32>
      %35 = vector.shape_cast %34 : vector<1xf32> to vector<1x1x1xf32>
      %36 = vector.extract %35[0, 0, 0] : f32 from vector<1x1x1xf32>
      %cst_27 = arith.constant 0.000000e+00 : f32
      %37 = vector.broadcast %36 : f32 to vector<1x1x128xf32>
      %38 = vector.broadcast %cst_27 : f32 to vector<1x1x128xf32>
      %39 = arith.select %31, %37, %38 : vector<1x1x128xi1>, vector<1x1x128xf32>
      %c1_i32 = arith.constant 1 : i32
      %40 = vector.broadcast %c1_i32 : i32 to vector<1x1x128xi32>
      %41 = arith.cmpi eq, %29, %40 : vector<1x1x128xi32>
      %c0_28 = arith.constant 0 : index
      %c0_29 = arith.constant 0 : index
      %42 = vector.load %arg8[%c0_28, %c0_29] : memref<32x128xf32, #tpu.memory_space<vmem>>, vector<32x128xf32>
      %43 = vector.shape_cast %42 : vector<32x128xf32> to vector<1x32x128xf32>
      %cst_30 = arith.constant dense<0.000000e+00> : vector<1xf32>
      %44 = vector.multi_reduction <add>, %43, %cst_30 [1, 2] : vector<1x32x128xf32> to vector<1xf32>
      %45 = vector.shape_cast %44 : vector<1xf32> to vector<1x1x1xf32>
      %46 = vector.extract %45[0, 0, 0] : f32 from vector<1x1x1xf32>
      %cst_31 = arith.constant 0.000000e+00 : f32
      %47 = vector.broadcast %46 : f32 to vector<1x1x128xf32>
      %48 = vector.broadcast %cst_31 : f32 to vector<1x1x128xf32>
      %49 = arith.select %41, %47, %48 : vector<1x1x128xi1>, vector<1x1x128xf32>
      %50 = arith.addf %39, %49 : vector<1x1x128xf32>
      %c0_32 = arith.constant 0 : index
      %c0_33 = arith.constant 0 : index
      %c0_34 = arith.constant 0 : index
      %51 = vector.load %arg6[%c0_32, %c0_33, %c0_34] : memref<1x1x128xf32, #tpu.memory_space<vmem>>, vector<1x1x128xf32>
      tpu.vector_store %arg6[%c0_32, %c0_33, %c0_34], %50 {strides = array<i32>} : memref<1x1x128xf32, #tpu.memory_space<vmem>>, vector<1x1x128xf32>,
    } else {
    }
    return
  }
  func.func @transform_0(%arg0: i32, %arg1: i32) -> (i32, i32) {
    %c0_i32 = arith.constant 0 : i32
    %c0_i32_0 = arith.constant 0 : i32
    %c0_i32_1 = arith.constant 0 : i32
    return %c0_i32, %c0_i32_0 : i32, i32
  }
  func.func @transform_1(%arg0: i32, %arg1: i32) -> (i32, i32) {
    %c0_i32 = arith.constant 0 : i32
    %c0_i32_0 = arith.constant 0 : i32
    %c0_i32_1 = arith.constant 0 : i32
    return %c0_i32, %c0_i32_0 : i32, i32
  }
  func.func @transform_2(%arg0: i32, %arg1: i32) -> (i32, i32, i32) {
    %c1_i32 = arith.constant 1 : i32
    %0 = arith.muli %arg0, %c1_i32 : i32
    %1 = arith.addi %0, %arg1 : i32
    %c0_i32 = arith.constant 0 : i32
    %c0_i32_0 = arith.constant 0 : i32
    %c0_i32_1 = arith.constant 0 : i32
    return %1, %c0_i32, %c0_i32_0 : i32, i32, i32
  }
  func.func @transform_3(%arg0: i32, %arg1: i32) -> (i32, i32, i32) {
    %c1_i32 = arith.constant 1 : i32
    %0 = arith.muli %arg0, %c1_i32 : i32
    %1 = arith.addi %0, %arg1 : i32
    %c0_i32 = arith.constant 0 : i32
    %c0_i32_0 = arith.constant 0 : i32
    %c0_i32_1 = arith.constant 0 : i32
    return %1, %c0_i32, %c0_i32_0 : i32, i32, i32
  }
  func.func @transform_4(%arg0: i32, %arg1: i32) -> (i32, i32, i32) {
    %c0_i32 = arith.constant 0 : i32
    %c0_i32_0 = arith.constant 0 : i32
    %c0_i32_1 = arith.constant 0 : i32
    return %arg0, %c0_i32, %c0_i32_0 : i32, i32, i32
  }
}

</mosaic_0001>

<bundles_post_ra>
// kernel: silog_loss.1
= control target key start
LH: loop header
LB: loop body
LE: loop exit
PB: predicated region body
PF: predicated region fallthrough
CT: control target
= control target key end

     0   :  { %s806_s15 = smov 0   ;;  %s808_s16 = smov 0   ;;  %s883_s0 = inlined_call_operand.vmem [shape: f32[32,16], index: 0, kind: input, shape index: {}]   ;;  %s884_s1 = inlined_call_operand.vmem [shape: f32[64,128], index: 1, kind: input, shape index: {}]   ;;  %s885_s2 = inlined_call_operand.vmem [shape: bf16[2,16,64], index: 2, kind: input, shape index: {}]   ;;  %s886_s3 = inlined_call_operand.vmem [shape: bf16[2,32,128], index: 3, kind: input, shape index: {}]   ;;  %s887_s4 = inlined_call_operand.vmem [shape: f32[2,1,128], index: 4, kind: output, shape index: {}]  }
   0x1   :  { %s810_s17 = smov 0  }
   0x2 LB: > { %s26_s18 = sadd.s32 1, %s775_s16  ;;  %p620_p0 = scmp.ge.s32.totalorder %s779_s17, 1  ;;  %s779_s17 = sphi %s810_s17, %s14_s17   ;;  %s775_s16 = sphi %s808_s16, %s889_s16   ;;  %s771_s15 = sphi %s806_s15, %s888_s15  }
   0x3   : > { %p28_p1 = scmp.ge.s32.totalorder %s26_s18, 2  ;;  %p192_p2 = scmp.lt.s32.totalorder %s779_s17, 3 }
   0x5   : > { %s891_s18 = smov (%p28_p1, %s26_s18), 0  ;;  %p193_p3 = pnand %p620_p0, %p192_p2 }
   0x6   : > { %v256_v0 = vld [vmem:[%s884_s1] sm:$0xff] (!%p193_p3)  ;;  %v257_v1 = vld [vmem:[%s884_s1 + $0x8] sm:$0xff] (!%p193_p3)  ;;  %v258_v2 = vld [vmem:[%s884_s1 + $0x10] sm:$0xff] (!%p193_p3)  ;;  %p224_p4 = scmp.lt.s32.totalorder (!%p193_p3), %s771_s15, 1  ;;  %vm264_vm0 = vcmask (!%p193_p3), 523264   ;;  %vm358_vm1 = vcmask (!%p193_p3), 130048  }
   0x7   : > { %196 = sbr.rel (%p193_p3) target bundleno = 695 (0x2b7), region = 36  ;;  %v693_v3 = vpack.c.bf16 (!%p193_p3), %v257_v1, %v256_v0  ;;  %v259_v4 = vld [vmem:[%s884_s1 + $0x18] sm:$0xff] (!%p193_p3)  ;;  %v260_v6 = vld [vmem:[%s884_s1 + $0x20] sm:$0xff] (!%p193_p3)  ;;  %v261_v7 = vld [vmem:[%s884_s1 + $0x28] sm:$0xff] (!%p193_p3) }
   0x8   : > { %v697_v5 = vpack.c.bf16 (!%p193_p3), %v259_v4, %v258_v2  ;;  %v701_v8 = vpack.c.bf16 (!%p193_p3), %v261_v7, %v260_v6  ;;  %v262_v9 = vld [vmem:[%s884_s1 + $0x30] sm:$0xff] (!%p193_p3)  ;;  %v263_v10 = vld [vmem:[%s884_s1 + $0x38] sm:$0xff] (!%p193_p3)  ;;  %v346_v15 = vld [vmem:[%s883_s0] sm:$0xff] (!%p193_p3) }
   0x9   : > { %694 = vmatprep.subr.bf16.mxu0 (!%p193_p3), %v693_v3  ;;  %v705_v13 = vpack.c.bf16 (!%p193_p3), %v263_v10, %v262_v9  ;;  %687 = vmatprep.mubr.msk.f32.mxu1 (!%p193_p3), %vm358_vm1, %v346_v15  ;;  %v347_v19 = vld [vmem:[%s883_s0 + $0x8] sm:$0xff] (!%p193_p3)  ;;  %v348_v20 = vld [vmem:[%s883_s0 + $0x10] sm:$0xff] (!%p193_p3)  ;;  %v349_v21 = vld [vmem:[%s883_s0 + $0x18] sm:$0xff] (!%p193_p3) }
   0xa   : > { %696 = vmatpush3.bf16.msra.mxu0 (!%p193_p3), %v693_v3 }
   0xb   : > { %698 = vmatprep.subr.bf16.mxu0 (!%p193_p3), %v697_v5 }
   0xe   : > { %s893_s15 = smov (!%p224_p4, %s771_s15), 1  ;;  %700 = vmatpush3.bf16.msra.mxu0 %v697_v5 }
   0xf   : > { %s633_s5 = sshll.u32 %s893_s15, 3  ;;  %702 = vmatprep.subr.bf16.mxu0 %v701_v8  ;;  %s634_s25 = sshll.u32 %s893_s15, 4 }
  0x10   : > { %s228_s8 = scalar_lea.vmem %s885_s2, %s633_s5  ;;  %s235_s28 = scalar_lea.vmem %s886_s3, %s634_s25 }
  0x11   : > { %v636_v11 = vld [vmem:[%s228_s8] sm:$0xff]   ;;  %v647_v25 = vld [vmem:[%s235_s28 + $0x8] sm:$0xff]   ;;  %s239_s7 = scalar_lea.vmem %s887_s4, %s893_s15 }
  0x12   : > { %v637_v12 = vunpack.c.l.bf16 %v636_v11  ;;  %704 = vmatpush3.bf16.msra.mxu0 %v701_v8  ;;  %v638_v14 = vunpack.c.h.bf16 %v636_v11  ;;  %v640_v22 = vld [vmem:[%s235_s28] sm:$0xff]   ;;  %v646_v26 = vunpack.c.h.bf16 %v647_v25  ;;  %v645_v29 = vunpack.c.l.bf16 %v647_v25 }
  0x13   : > { %706 = vmatprep.subr.bf16.mxu0 %v705_v13  ;;  %v642_v23 = vunpack.c.h.bf16 %v640_v22  ;;  %v641_v24 = vunpack.c.l.bf16 %v640_v22 }
  0x14   : > { %680 = vmatprep.mubr.msk.f32.mxu0 %vm264_vm0, %v637_v12  ;;  %v459_v30 = vadd.f32 1e-06, %v646_v26  ;;  %v458_v31 = vadd.f32 1e-06, %v645_v29 }
  0x15   : > { %v457_v27 = vadd.f32 1e-06, %v642_v23  ;;  %v456_v28 = vadd.f32 1e-06, %v641_v24 }
  0x16   : > { %708 = vmatpush3.bf16.msra.mxu0 %v705_v13 }
  0x17   : > { %741 = vrcp.f32 %v457_v27 }
  0x18   : > { %743 = vrcp.f32 %v456_v28 }
  0x19   : > { %681 = vmatmul.mubr.msk.f32.vlgmr.msra.gmra.mrb[0].mxu0 %vm264_vm0, %v638_v14  ;;  %745 = vrcp.f32 %v459_v30 }
  0x1a   : > { %747 = vrcp.f32 %v458_v31 }
  0x21   : > { %v742_v32 = vpop.eup %741 }
  0x22   : > { %v744_v34 = vpop.eup %743 }
  0x23   : > { %v746_v39 = vpop.eup %745 }
  0x24   : > { %v748_v42 = vpop.eup %747 }
  0xec   : > { %v682_v16 = vpop.f32.mrb[0].mxu0 }
  0xed   : > { %v337_v17 = vpop.f32.mrb[1].mxu0 }
  0xee   : > { %v709_v18 = vpack.c.bf16 %v682_v16, %v337_v17  ;;  %v507_v16 = vlaneseq }
  0xf0   : > { %710 = vmatprep.subr.bf16.mxu1 %v709_v18  ;;  %v508_v17 = vand.u32 127, %v507_v16 }
  0xf1   : > { %712 = vmatpush3.bf16.msra.mxu1 %v709_v18 }
  0xf2   : > { %vm509_vm2 = vcmp.eq.s32.totalorder %v508_v17, 0  ;;  %vm528_vm3 = vcmp.eq.s32.totalorder %v508_v17, 1 }
  0xf4   : > { %688 = vmatmul.mubr.msk.f32.vlgmr.msra.gmra.mrb[0].mxu1 %vm358_vm1, %v347_v19 }
  0xf5   : > { %690 = vmatprep.mubr.msk.f32.mxu1 %vm358_vm1, %v348_v20 }
  0xf8   : > { %691 = vmatmul.mubr.msk.f32.gmra.mrb[2].mxu1 %vm358_vm1, %v349_v21 }
 0x1c7   : > { %v689_v33 = vpop.f32.mrb[0].mxu1 }
 0x1c8   : > { %v443_v35 = vadd.f32 1e-06, %v689_v33  ;;  %v437_v36 = vpop.f32.mrb[1].mxu1 }
 0x1c9   : > { %v438_v37 = vadd.f32 1e-06, %v437_v36 }
 0x1ca   : > { %v463_v38 = vmul.f32 %v742_v32, %v443_v35 }
 0x1cb   : > { %v461_v40 = vmul.f32 %v744_v34, %v438_v37  ;;  %v692_v41 = vpop.f32.mrb[2].mxu1 }
 0x1cc   : > { %749 = vlog2.f32 %v463_v38  ;;  %v453_v43 = vadd.f32 1e-06, %v692_v41  ;;  %v447_v44 = vpop.f32.mrb[3].mxu1 }
 0x1cd   : > { %751 = vlog2.f32 %v461_v40  ;;  %v448_v45 = vadd.f32 1e-06, %v447_v44 }
 0x1ce   : > { %v467_v46 = vmul.f32 %v746_v39, %v453_v43 }
 0x1cf   : > { %v465_v47 = vmul.f32 %v748_v42, %v448_v45 }
 0x1d0   : > { %753 = vlog2.f32 %v467_v46 }
 0x1d1   : > { %755 = vlog2.f32 %v465_v47 }
 0x1d6   : > { %v750_v48 = vpop.eup %749 }
 0x1d7   : > { %v752_v49 = vpop.eup %751  ;;  %v471_v50 = vmul.f32 0.6931472, %v750_v48 }
 0x1d8   : > { %v469_v51 = vmul.f32 0.6931472, %v752_v49 }
 0x1d9   : > { %v493_v52 = vmul.f32 %v471_v50, %v471_v50 }
 0x1da   : > { %v754_v53 = vpop.eup %753  ;;  %v514_v54 = vadd.f32 %v471_v50, %v469_v51  ;;  %v492_v55 = vmul.f32 %v469_v51, %v469_v51 }
 0x1db   : > { %v756_v56 = vpop.eup %755  ;;  %v475_v58 = vmul.f32 0.6931472, %v754_v53 }
 0x1dc   : > { %v473_v57 = vmul.f32 0.6931472, %v756_v56  ;;  %v533_v59 = vadd.f32 %v493_v52, %v492_v55 }
 0x1dd   : > { %v495_v63 = vmul.f32 %v475_v58, %v475_v58 }
 0x1de   : > { %v515_v60 = vadd.f32 %v514_v54, %v473_v57  ;;  %v494_v61 = vmul.f32 %v473_v57, %v473_v57 }
 0x1e0   : > { %v516_v62 = vadd.f32 %v515_v60, %v475_v58  ;;  %v534_v0 = vadd.f32 %v533_v59, %v494_v61 }
 0x1e2   : > { %517 = vadd.xlane.f32.xlu0 %v516_v62  ;;  %v535_v1 = vadd.f32 %v534_v0, %v495_v63 }
 0x1e6   : > { %536 = vadd.xlane.f32.xlu0 %v535_v1 }
 0x26f   : > { %v518_v2 = vpop.xlane.xlu0 %517 }
 0x270   : > { %v519_v3 = vrot.slane %v518_v2, 4 }
 0x272   : > { %v520_v4 = vadd.f32 %v519_v3, %v518_v2 }
 0x273   : > { %v537_v5 = vpop.xlane.xlu0 %536 }
 0x274   : > { %v521_v6 = vrot.slane %v520_v4, 2  ;;  %v538_v7 = vrot.slane %v537_v5, 4 }
 0x276   : > { %v539_v8 = vadd.f32 %v538_v7, %v537_v5  ;;  %v522_v9 = vadd.f32 %v521_v6, %v520_v4 }
 0x278   : > { %v540_v10 = vrot.slane %v539_v8, 2  ;;  %v523_v11 = vrot.slane %v522_v9, 1 }
 0x27a   : > { %v541_v12 = vadd.f32 %v540_v10, %v539_v8  ;;  %v524_v13 = vadd.f32 %v523_v11, %v522_v9 }
 0x27c   : > { %713 = vpush %v524_v13  ;;  %v542_v14 = vrot.slane %v541_v12, 1 }
 0x27e   : > { %v543_v15 = vadd.f32 %v542_v14, %v541_v12 }
 0x280   : > { %715 = vpush %v543_v15 }
 0x2ad   : > { %s714_s29 = spop %713 }
 0x2ae   : > { %v526_v18 = vstv %s714_s29 }
 0x2af   : > { %v527_v20 = vsel %vm509_vm2, %v526_v18, 0.0 }
 0x2b1   : > { %s716_s30 = spop %715 }
 0x2b2   : > { %v545_v19 = vstv %s716_s30 }
 0x2b3   : > { %v546_v21 = vsel %vm528_vm3, %v545_v19, 0.0 }
 0x2b4   : > { %v547_v22 = vadd.f32 %v546_v21, %v527_v20 }
 0x2b6   : > { %548 = vst [vmem:[%s239_s7] sm:$0x1] %v547_v22 }
 0x2b7 PF: > { %s14_s17 = sadd.s32 1, %s779_s17   ;;  %s888_s15 = smov %s775_s16 }
 0x2b8   : > { %p11_p5 = scmp.ge.s32.totalorder %s14_s17, 4   ;;  %s889_s16 = smov %s891_s18 }
 0x2ba   :  { %13 = sbr.rel (!%p11_p5) target bundleno = 2 (0x2), region = 77 }

</bundles_post_ra>
